<compile_context>
chip_gen: v6e
topology: v6e:2x2x1
jax: 0.10.0
libtpu: 0.0.40
codegen_flags: <defaults>
</compile_context>

<pallas_src>
import jax
import jax.numpy as jnp
import numpy as np
from jax.experimental import pallas as pl
from jax.experimental.pallas import tpu as pltpu

LANES = 128
SUBLANES = 8


def _round_up(x, m):
    return (x + m - 1) // m * m


def _pick_tile(dim, candidates):
    for c in candidates:
        if dim >= c and dim % c == 0:
            return c
    return dim


# ---------------------------------------------------------------------------
# Generic tiled GEMM (+ bias) kernel: used for the QKV projection and the
# output projection.  Full-width / full-depth MXU GEMMs, f32 accumulation.
# ---------------------------------------------------------------------------
def _matmul_bias_kernel(x_ref, w_ref, b_ref, o_ref, acc_ref):
    @pl.when(pl.program_id(2) == 0)
    def _init():
        acc_ref[...] = jnp.zeros_like(acc_ref)

    acc_ref[...] += jnp.dot(x_ref[...], w_ref[...],
                            preferred_element_type=jnp.float32)

    @pl.when(pl.program_id(2) == pl.num_programs(2) - 1)
    def _store():
        o_ref[...] = (acc_ref[...] + b_ref[...]).astype(o_ref.dtype)


def matmul_bias(x, w, b, *, out_dtype, compute_dtype):
    """y = x @ w + b.   x: [M, K], w: [K, N], b: [N] (f32).  Returns [M, N]."""
    M, K = x.shape
    K2, N = w.shape
    assert K == K2 and b.shape == (N,)

    Kp = _round_up(K, LANES)
    Np = _round_up(N, LANES)                      # lane-dense output blocks
    tm = min(256, _round_up(M, SUBLANES))
    Mp = _round_up(M, tm)
    tn = _pick_tile(Np, (512, 256, 128))
    tk = _pick_tile(Kp, (512, 256, 128))

    xp = jnp.pad(x, ((0, Mp - M), (0, Kp - K))).astype(compute_dtype)
    wp = jnp.pad(w, ((0, Kp - K), (0, Np - N))).astype(compute_dtype)
    bp = jnp.pad(b.astype(jnp.float32), (0, Np - N)).reshape(1, Np)

    itemsize = jnp.dtype(compute_dtype).itemsize
    cost = pl.CostEstimate(
        flops=int(2 * Mp * Np * Kp),
        transcendentals=0,
        bytes_accessed=int(Mp * Kp * itemsize * (Np // tn)     # x re-read per n-tile
                           + Kp * Np * itemsize * (Mp // tm)   # w re-read per m-tile
                           + Mp * Np * jnp.dtype(out_dtype).itemsize),
    )

    out = pl.pallas_call(
        _matmul_bias_kernel,
        out_shape=jax.ShapeDtypeStruct((Mp, Np), out_dtype),
        grid_spec=pltpu.PrefetchScalarGridSpec(
            num_scalar_prefetch=0,
            grid=(Mp // tm, Np // tn, Kp // tk),
            in_specs=[
                pl.BlockSpec((tm, tk), lambda i, j, k: (i, k)),
                pl.BlockSpec((tk, tn), lambda i, j, k: (k, j)),
                pl.BlockSpec((1, tn), lambda i, j, k: (0, j)),
            ],
            out_specs=pl.BlockSpec((tm, tn), lambda i, j, k: (i, j)),
            scratch_shapes=[pltpu.VMEM((tm, tn), jnp.float32)],
        ),
        compiler_params=pltpu.CompilerParams(
            dimension_semantics=("parallel", "parallel", "arbitrary"),
            vmem_limit_bytes=48 * 1024 * 1024,
        ),
        cost_estimate=cost,
    )(xp, wp, bp)
    return out[:M, :N]


# ---------------------------------------------------------------------------
# Flash-attention kernel on head-major, already-projected q/k/v.
# grid = (batch, q_tiles, kv_tiles); online softmax statistics in f32.
# ---------------------------------------------------------------------------
def make_flash_kernel(approx_rcp):
    f32 = jnp.float32

    def kernel(q_ref, k_ref, v_ref, o_ref, m_scr, l_scr, acc_scr):
        ki = pl.program_id(2)

        @pl.when(ki == 0)
        def _init():
            m_scr[...] = jnp.full(m_scr.shape, -jnp.inf, dtype=f32)
            l_scr[...] = jnp.zeros(l_scr.shape, dtype=f32)
            acc_scr[...] = jnp.zeros(acc_scr.shape, dtype=f32)

        # Scores for all heads at once: (h, tq, tk) with f32 accumulation.
        s = jnp.einsum('hqd,hkd->hqk', q_ref[...], k_ref[...],
                       preferred_element_type=f32)

        # Online softmax update (all statistics kept in f32 on every chip).
        m_prev = m_scr[...]
        m_new = jnp.maximum(m_prev, jnp.max(s, axis=-1, keepdims=True))
        alpha = jnp.exp(m_prev - m_new)
        # TODO(synk): on v6e/v7x (bf16 EUP), casting s to bf16 before exp can
        # roughly double EUP throughput if exp becomes the binding unit.
        p = jnp.exp(s - m_new)
        l_scr[...] = alpha * l_scr[...] + jnp.sum(p, axis=-1, keepdims=True)
        pv = jnp.einsum('hqk,hkd->hqd', p.astype(v_ref.dtype), v_ref[...],
                        preferred_element_type=f32)
        acc_scr[...] = alpha * acc_scr[...] + pv
        m_scr[...] = m_new

        @pl.when(ki == pl.num_programs(2) - 1)
        def _epilogue():
            inv_l = pl.reciprocal(l_scr[...], approx=approx_rcp)
            o_ref[...] = (acc_scr[...] * inv_l).astype(o_ref.dtype)

    return kernel


def flash_attention(q, k, v, *, block_q, block_k):
    """q, k, v: [B, H, S, D] (q pre-scaled).  Returns [B, H, S, D]."""
    B, H, S, D = q.shape
    tq = min(block_q, S)
    tk = min(block_k, S)
    assert S % tq == 0 and S % tk == 0, "seq len must divide the tile sizes"
    # TODO(synk): for S not divisible by the tile size, pad S and mask the
    # padded keys with -inf before the softmax (and guard the all-masked row).

    approx_rcp = jnp.dtype(q.dtype) != jnp.dtype(jnp.float32)
    itemsize = jnp.dtype(q.dtype).itemsize
    cost = pl.CostEstimate(
        flops=int(4 * B * H * S * S * D),
        transcendentals=int(B * H * S * S),
        bytes_accessed=int(itemsize * (B * H * S * D                  # q read once
                                       + 2 * B * H * S * D * (S // tq)  # k, v per q tile
                                       + B * H * S * D)),             # out write
    )

    return pl.pallas_call(
        make_flash_kernel(approx_rcp),
        out_shape=jax.ShapeDtypeStruct((B, H, S, D), q.dtype),
        grid_spec=pltpu.PrefetchScalarGridSpec(
            num_scalar_prefetch=0,
            grid=(B, S // tq, S // tk),
            in_specs=[
                pl.BlockSpec((None, H, tq, D), lambda b, qi, ki: (b, 0, qi, 0)),
                pl.BlockSpec((None, H, tk, D), lambda b, qi, ki: (b, 0, ki, 0)),
                pl.BlockSpec((None, H, tk, D), lambda b, qi, ki: (b, 0, ki, 0)),
            ],
            out_specs=pl.BlockSpec((None, H, tq, D),
                                   lambda b, qi, ki: (b, 0, qi, 0)),
            scratch_shapes=[
                pltpu.VMEM((H, tq, 1), jnp.float32),   # running max
                pltpu.VMEM((H, tq, 1), jnp.float32),   # running sum
                pltpu.VMEM((H, tq, D), jnp.float32),   # running output
            ],
        ),
        compiler_params=pltpu.CompilerParams(
            dimension_semantics=("parallel", "parallel", "arbitrary"),
            vmem_limit_bytes=48 * 1024 * 1024,
        ),
        cost_estimate=cost,
    )(q, k, v)


# ---------------------------------------------------------------------------
# Top level: SelfAttention forward (normal_attention semantics).
# ---------------------------------------------------------------------------
def _default_attention_tiles():
    # v5e/v5p: 128-wide MXU -> 128 kv tiles already saturate width.
    # v6e/v7x: 2x256 MXU -> wider kv tiles amortize per-step overhead.
    try:
        kind = jax.devices()[0].device_kind.lower()
    except Exception:
        kind = ""
    if "v5" in kind:
        return 128, 128
    return 128, 256


def self_attention(x, wq, wk, wv, wo, bo, *, n_heads, d_head,
                   block_q=None, block_k=None, compute_dtype=jnp.bfloat16):
    """Pallas TPU forward of SelfAttention (normal_attention path).

    x:  [B, S, d_model]
    wq, wk, wv: [d_model, d_attn]  (nn.Linear weights pre-transposed to [in, out])
    wo: [d_attn, d_model]          (to_out[0] weight pre-transposed)
    bo: [d_model]                  (to_out[0] bias)
    """
    B, S, d_model = x.shape
    d_attn = n_heads * d_head
    assert wq.shape == (d_model, d_attn)
    assert wk.shape == (d_model, d_attn)
    assert wv.shape == (d_model, d_attn)
    assert wo.shape == (d_attn, d_model)
    assert bo.shape == (d_model,)
    orig_dtype = x.dtype
    scale = float(d_head) ** -0.5

    if block_q is None or block_k is None:
        dq, dk = _default_attention_tiles()
        block_q = block_q or dq
        block_k = block_k or dk

    # --- QKV projection: ONE full-width GEMM, hoisted out of the flash grid.
    # The softmax scale is folded into wq (linear, exact up to f32 rounding).
    w_qkv = jnp.concatenate([wq.astype(jnp.float32) * scale,
                             wk.astype(jnp.float32),
                             wv.astype(jnp.float32)], axis=1)      # [d_model, 3*d_attn]
    x2d = x.reshape(B * S, d_model)
    qkv = matmul_bias(x2d, w_qkv, jnp.zeros((3 * d_attn,), jnp.float32),
                      out_dtype=compute_dtype, compute_dtype=compute_dtype)

    qkv = qkv.reshape(B, S, 3, n_heads, d_head)
    q = jnp.transpose(qkv[:, :, 0], (0, 2, 1, 3))    # [B, H, S, D], pre-scaled
    k = jnp.transpose(qkv[:, :, 1], (0, 2, 1, 3))
    v = jnp.transpose(qkv[:, :, 2], (0, 2, 1, 3))

    # --- Flash attention (K/V only read once per q tile; no projections inside).
    o = flash_attention(q, k, v, block_q=block_q, block_k=block_k)  # [B, H, S, D]

    # --- Output projection: heads folded into the contraction (K = d_attn),
    # one full-depth GEMM with the bias added in f32.
    o2d = jnp.transpose(o, (0, 2, 1, 3)).reshape(B * S, d_attn)
    y = matmul_bias(o2d, wo.astype(jnp.float32), bo.astype(jnp.float32),
                    out_dtype=jnp.float32, compute_dtype=compute_dtype)
    return y.reshape(B, S, d_model).astype(orig_dtype)


def self_attention_ref(x, wq, wk, wv, wo, bo, *, n_heads, d_head):
    """Pure-JAX reference mirroring PyTorch normal_attention semantics."""
    B, S, _ = x.shape
    scale = float(d_head) ** -0.5
    q = (x @ wq).reshape(B, S, n_heads, d_head)
    k = (x @ wk).reshape(B, S, n_heads, d_head)
    v = (x @ wv).reshape(B, S, n_heads, d_head)
    attn = jnp.einsum('bihd,bjhd->bhij', q, k) * scale
    attn = jax.nn.softmax(attn, axis=-1)
    out = jnp.einsum('bhij,bjhd->bihd', attn, v).reshape(B, S, n_heads * d_head)
    return out @ wo + bo


if __name__ == "__main__":
    B, S = 2, 8
    d_model, n_heads, d_head = 32, 4, 8
    d_attn = n_heads * d_head

    key = jax.random.PRNGKey(0)
    kx, kq, kk, kv, ko, kb = jax.random.split(key, 6)

    x = jax.random.normal(kx, (B, S, d_model), dtype=jnp.float32)
    # nn.Linear weights stored pre-transposed as [in_features, out_features].
    wq = jax.random.normal(kq, (d_model, d_attn), dtype=jnp.float32) * 0.05
    wk = jax.random.normal(kk, (d_model, d_attn), dtype=jnp.float32) * 0.05
    wv = jax.random.normal(kv, (d_model, d_attn), dtype=jnp.float32) * 0.05
    wo = jax.random.normal(ko, (d_attn, d_model), dtype=jnp.float32) * 0.05
    bo = jax.random.normal(kb, (d_model,), dtype=jnp.float32) * 0.05

    ref = self_attention_ref(x, wq, wk, wv, wo, bo,
                             n_heads=n_heads, d_head=d_head)

    # f32-operand path: tight check against the reference.
    out_f32 = self_attention(x, wq, wk, wv, wo, bo, n_heads=n_heads,
                             d_head=d_head, compute_dtype=jnp.float32)
    out_f32 = jax.block_until_ready(out_f32)
    np.testing.assert_allclose(np.asarray(out_f32), np.asarray(ref),
                               rtol=1e-4, atol=1e-4)

    # bf16-operand path (MXU-friendly on v6e/v7x): looser tolerance.
    out_bf16 = self_attention(x, wq, wk, wv, wo, bo, n_heads=n_heads,
                              d_head=d_head, compute_dtype=jnp.bfloat16)
    out_bf16 = jax.block_until_ready(out_bf16)
    np.testing.assert_allclose(np.asarray(out_bf16), np.asarray(ref),
                               rtol=5e-2, atol=5e-2)

    print("KERNEL_OK")
</pallas_src>

<mosaic_0001>
module attributes {stable_mosaic.version = 11 : i64} {
  func.func @_matmul_bias_kernel(%arg0: i32, %arg1: i32, %arg2: i32, %arg3: memref<16x128xf32, #tpu.memory_space<vmem>>, %arg4: memref<128x128xf32, #tpu.memory_space<vmem>>, %arg5: memref<1x128xf32, #tpu.memory_space<vmem>>, %arg6: memref<16x128xf32, #tpu.memory_space<vmem>>, %arg7: memref<16x128xf32, #tpu.memory_space<vmem>>) attributes {dimension_semantics = [#tpu.dimension_semantics<parallel>, #tpu.dimension_semantics<parallel>, #tpu.dimension_semantics<arbitrary>], iteration_bounds = array<i64: 1, 1, 1>, scalar_prefetch = 0 : i64, scratch_operands = 1 : i64, tpu.core_type = #tpu.core_type<tc>, window_params = [{transform_indices = @transform_0, window_bounds = array<i64: 16, 128>}, {transform_indices = @transform_1, window_bounds = array<i64: 128, 128>}, {transform_indices = @transform_2, window_bounds = array<i64: 1, 128>}, {transform_indices = @transform_3, window_bounds = array<i64: 16, 128>}]} {
    %c0_i32 = arith.constant 0 : i32
    %0 = arith.cmpi eq, %arg2, %c0_i32 : i32
    %1 = arith.extui %0 : i1 to i32
    %c0_i32_0 = arith.constant 0 : i32
    %2 = arith.cmpi ne, %1, %c0_i32_0 : i32
    scf.if %2 {
      %cst_10 = arith.constant 0.000000e+00 : f32
      %12 = vector.broadcast %cst_10 : f32 to vector<16x128xf32>
      %c0_11 = arith.constant 0 : index
      %c0_12 = arith.constant 0 : index
      %13 = vector.load %arg7[%c0_11, %c0_12] : memref<16x128xf32, #tpu.memory_space<vmem>>, vector<16x128xf32>
      tpu.vector_store %arg7[%c0_11, %c0_12], %12 {strides = array<i32>} : memref<16x128xf32, #tpu.memory_space<vmem>>, vector<16x128xf32>,
    } else {
    }
    %c0 = arith.constant 0 : index
    %c0_1 = arith.constant 0 : index
    %3 = vector.load %arg7[%c0, %c0_1] : memref<16x128xf32, #tpu.memory_space<vmem>>, vector<16x128xf32>
    %c0_2 = arith.constant 0 : index
    %c0_3 = arith.constant 0 : index
    %4 = vector.load %arg3[%c0_2, %c0_3] : memref<16x128xf32, #tpu.memory_space<vmem>>, vector<16x128xf32>
    %c0_4 = arith.constant 0 : index
    %c0_5 = arith.constant 0 : index
    %5 = vector.load %arg4[%c0_4, %c0_5] : memref<128x128xf32, #tpu.memory_space<vmem>>, vector<128x128xf32>
    %cst = arith.constant dense<0.000000e+00> : vector<16x128xf32>
    %6 = tpu.matmul %4, %5, %cst {dimension_numbers = #tpu.dot_dimension_numbers<[1], [0], [0], [1], [0, 0, 1, 1], [], []>} : vector<16x128xf32>, vector<128x128xf32>, vector<16x128xf32> -> vector<16x128xf32>
    %7 = arith.addf %3, %6 : vector<16x128xf32>
    %c0_6 = arith.constant 0 : index
    %c0_7 = arith.constant 0 : index
    %8 = vector.load %arg7[%c0_6, %c0_7] : memref<16x128xf32, #tpu.memory_space<vmem>>, vector<16x128xf32>
    tpu.vector_store %arg7[%c0_6, %c0_7], %7 {strides = array<i32>} : memref<16x128xf32, #tpu.memory_space<vmem>>, vector<16x128xf32>,
    %c0_i32_8 = arith.constant 0 : i32
    %9 = arith.cmpi eq, %arg2, %c0_i32_8 : i32
    %10 = arith.extui %9 : i1 to i32
    %c0_i32_9 = arith.constant 0 : i32
    %11 = arith.cmpi ne, %10, %c0_i32_9 : i32
    scf.if %11 {
      %c0_10 = arith.constant 0 : index
      %c0_11 = arith.constant 0 : index
      %12 = vector.load %arg7[%c0_10, %c0_11] : memref<16x128xf32, #tpu.memory_space<vmem>>, vector<16x128xf32>
      %c0_12 = arith.constant 0 : index
      %c0_13 = arith.constant 0 : index
      %13 = vector.load %arg5[%c0_12, %c0_13] : memref<1x128xf32, #tpu.memory_space<vmem>>, vector<1x128xf32>
      %14 = vector.broadcast %13 : vector<1x128xf32> to vector<16x128xf32>
      %15 = arith.addf %12, %14 : vector<16x128xf32>
      %c0_14 = arith.constant 0 : index
      %c0_15 = arith.constant 0 : index
      %16 = vector.load %arg6[%c0_14, %c0_15] : memref<16x128xf32, #tpu.memory_space<vmem>>, vector<16x128xf32>
      tpu.vector_store %arg6[%c0_14, %c0_15], %15 {strides = array<i32>} : memref<16x128xf32, #tpu.memory_space<vmem>>, vector<16x128xf32>,
    } else {
    }
    return
  }
  func.func @transform_0(%arg0: i32, %arg1: i32, %arg2: i32) -> (i32, i32) {
    %c0_i32 = arith.constant 0 : i32
    return %arg0, %arg2 : i32, i32
  }
  func.func @transform_1(%arg0: i32, %arg1: i32, %arg2: i32) -> (i32, i32) {
    %c0_i32 = arith.constant 0 : i32
    return %arg2, %arg1 : i32, i32
  }
  func.func @transform_2(%arg0: i32, %arg1: i32, %arg2: i32) -> (i32, i32) {
    %c0_i32 = arith.constant 0 : i32
    %c0_i32_0 = arith.constant 0 : i32
    return %c0_i32, %arg1 : i32, i32
  }
  func.func @transform_3(%arg0: i32, %arg1: i32, %arg2: i32) -> (i32, i32) {
    %c0_i32 = arith.constant 0 : i32
    return %arg0, %arg1 : i32, i32
  }
}

</mosaic_0001>

<bundles_post_ra>
// kernel: tpu_custom_call.1
= control target key start
LH: loop header
LB: loop body
LE: loop exit
PB: predicated region body
PF: predicated region fallthrough
CT: control target
= control target key end

     0   :  { %8 = vsyncpa [#allocation4], 0  ;;  %s353_s0 = inlined_call_operand.hbm [shape: f32[16,128], index: 0, kind: input, shape index: {}]   ;;  %s354_s1 = inlined_call_operand.hbm [shape: f32[128,128], index: 1, kind: input, shape index: {}]   ;;  %s355_s2 = inlined_call_operand.vmem [shape: f32[1,128], index: 2, kind: input, shape index: {}]   ;;  %s356_s3 = inlined_call_operand.hbm [shape: f32[16,128], index: 3, kind: output, shape index: {}]  }
   0x1   :  { %9 = vsyncpa [#allocation7], 0 }
   0x2   :  { %10 = vsyncpa [#allocation5], 0  ;;  %s307_s12 = smov [#allocation3]  }
   0x3   :  { %s16_s13 = sshll.u32 %s307_s12, 4  ;;  %s17_s13 = int_to_ptr.vmem [resolvable:$true] %s16_s13 }
   0x4   :  { %s249_s14 = scalar_lea.vmem %s17_s13, 256  ;;  %p254_p1 = scmp.lt.s32.totalorder %s17_s13, %s17_s13 }
   0x5   :  { %p250_p0 = scmp.ne.s32.totalorder %s17_s13, %s249_s14  ;;  %p255_p2 = scmp.lt.s32.totalorder %s249_s14, %s249_s14 }
   0x7   :  { %p256_p3 = por %p255_p2, %p254_p1 }
   0x9   :  { %p257_p4 = pnand %p256_p3, %p250_p0 }
   0xb   :  { %260 = shalt.err (!%p257_p4)
}
   0xc   :  { %s308_s15 = smov 128   ;;  %s309_s16 = smov 8  }
   0xd   :  { %22 = dma.hbm_to_vmem [thread:$0]  %s353_s0, 256, %s17_s13, [#allocation4], %s308_s15, %s308_s15, %s309_s16  }
   0xe   :  { %s310_s19 = smov [#allocation6]  }
   0xf   :  { %s28_s20 = sshll.u32 %s310_s19, 4  ;;  %s29_s20 = int_to_ptr.vmem [resolvable:$true] %s28_s20 }
  0x10   :  { %s269_s21 = scalar_lea.vmem %s29_s20, 2048  ;;  %p274_p6 = scmp.lt.s32.totalorder %s29_s20, %s29_s20 }
  0x11   :  { %p270_p5 = scmp.ne.s32.totalorder %s29_s20, %s269_s21  ;;  %p275_p7 = scmp.lt.s32.totalorder %s269_s21, %s269_s21 }
  0x13   :  { %p276_p8 = por %p275_p7, %p274_p6 }
  0x15   :  { %p277_p9 = pnand %p276_p8, %p270_p5 }
  0x17   :  { %280 = shalt.err (!%p277_p9)
}
  0x18   :  { %34 = dma.hbm_to_vmem [thread:$0]  %s354_s1, 2048, %s29_s20, [#allocation7], %s308_s15, %s308_s15, %s309_s16  }
  0x19   :  { %301 = dma.done.wait [#allocation4], 256  }
  0x1a   :  { %302 = vsyncadd [#allocation4], 4294967040 }
  0x1b   :  { %303 = dma.done.wait [#allocation7], 2048  }
  0x1c   :  { %304 = vsyncadd [#allocation7], 4294965248  ;;  %v68_v0 = vld [vmem:[#allocation6 + $0x78] sm:$0xff]  ;;  %v67_v1 = vld [vmem:[#allocation6 + $0x70] sm:$0xff]  ;;  %s311_s24 = smov [#allocation8]  }
  0x1d   :  { %201 = vmatprep.subr.mxu0 %v68_v0  ;;  %v66_v2 = vld [vmem:[#allocation6 + $0x68] sm:$0xff]  ;;  %v65_v3 = vld [vmem:[#allocation6 + $0x60] sm:$0xff]  ;;  %v51_v4 = vld [vmem:[#allocation3] sm:$0xff]  ;;  %s169_s25 = sshll.u32 %s311_s24, 4  ;;  %s170_s25 = int_to_ptr.vmem [resolvable:$true] %s169_s25 }
  0x1e   :  { %202 = vmatpush3.msra.mxu0 %v68_v0  ;;  %v64_v5 = vld [vmem:[#allocation6 + $0x58] sm:$0xff]  ;;  %233 = vmatprep.mubr.f32.mxu0 %v51_v4  ;;  %v63_v6 = vld [vmem:[#allocation6 + $0x50] sm:$0xff]  ;;  %v62_v7 = vld [vmem:[#allocation6 + $0x48] sm:$0xff]  ;;  %s281_s26 = scalar_lea.vmem %s170_s25, 256  ;;  %p286_p11 = scmp.lt.s32.totalorder %s170_s25, %s170_s25 }
  0x1f   :  { %203 = vmatprep.subr.mxu0 %v67_v1  ;;  %v61_v8 = vld [vmem:[#allocation6 + $0x40] sm:$0xff]  ;;  %v60_v9 = vld [vmem:[#allocation6 + $0x38] sm:$0xff]  ;;  %v59_v10 = vld [vmem:[#allocation6 + $0x30] sm:$0xff]  ;;  %p282_p10 = scmp.ne.s32.totalorder %s170_s25, %s281_s26  ;;  %p287_p12 = scmp.lt.s32.totalorder %s281_s26, %s281_s26 }
  0x20   :  { %204 = vmatpush3.msra.mxu0 %v67_v1  ;;  %v58_v11 = vld [vmem:[#allocation6 + $0x28] sm:$0xff]  ;;  %v57_v12 = vld [vmem:[#allocation6 + $0x20] sm:$0xff]  ;;  %v56_v13 = vld [vmem:[#allocation6 + $0x18] sm:$0xff] }
  0x21   :  { %205 = vmatprep.subr.mxu0 %v66_v2  ;;  %v55_v14 = vld [vmem:[#allocation6 + $0x10] sm:$0xff]  ;;  %v54_v15 = vld [vmem:[#allocation6 + $0x8] sm:$0xff]  ;;  %v53_v16 = vld [vmem:[#allocation6] sm:$0xff]  ;;  %p288_p13 = por %p287_p12, %p286_p11 }
  0x22   :  { %206 = vmatpush3.msra.mxu0 %v66_v2  ;;  %v52_v17 = vld [vmem:[#allocation3 + $0x8] sm:$0xff]  ;;  %v182_v18 = vld [vmem:[%s355_s2] ss:$0 sm:$0xff] }
  0x23   :  { %207 = vmatprep.subr.mxu0 %v65_v3  ;;  %p289_p0 = pnand %p288_p13, %p282_p10 }
  0x24   :  { %208 = vmatpush3.msra.mxu0 %v65_v3 }
  0x25   :  { %209 = vmatprep.subr.mxu0 %v64_v5 }
  0x26   :  { %210 = vmatpush3.msra.mxu0 %v64_v5 }
  0x27   :  { %211 = vmatprep.subr.mxu0 %v63_v6 }
  0x28   :  { %212 = vmatpush3.msra.mxu0 %v63_v6 }
  0x29   :  { %213 = vmatprep.subr.mxu0 %v62_v7 }
  0x2a   :  { %214 = vmatpush3.msra.mxu0 %v62_v7 }
  0x2b   :  { %215 = vmatprep.subr.mxu0 %v61_v8 }
  0x2c   :  { %216 = vmatpush3.msra.mxu0 %v61_v8 }
  0x2d   :  { %217 = vmatprep.subr.mxu0 %v60_v9 }
  0x2e   :  { %218 = vmatpush3.msra.mxu0 %v60_v9 }
  0x2f   :  { %219 = vmatprep.subr.mxu0 %v59_v10 }
  0x30   :  { %220 = vmatpush3.msra.mxu0 %v59_v10 }
  0x31   :  { %221 = vmatprep.subr.mxu0 %v58_v11 }
  0x32   :  { %222 = vmatpush3.msra.mxu0 %v58_v11 }
  0x33   :  { %223 = vmatprep.subr.mxu0 %v57_v12 }
  0x34   :  { %224 = vmatpush3.msra.mxu0 %v57_v12 }
  0x35   :  { %225 = vmatprep.subr.mxu0 %v56_v13 }
  0x36   :  { %226 = vmatpush3.msra.mxu0 %v56_v13 }
  0x37   :  { %227 = vmatprep.subr.mxu0 %v55_v14 }
  0x38   :  { %228 = vmatpush3.msra.mxu0 %v55_v14 }
  0x39   :  { %229 = vmatprep.subr.mxu0 %v54_v15 }
  0x3a   :  { %230 = vmatpush3.msra.mxu0 %v54_v15 }
  0x3b   :  { %231 = vmatprep.subr.mxu0 %v53_v16 }
  0x3c   :  { %232 = vmatpush3.msra.mxu0 %v53_v16 }
  0x3d   :  { %234 = vmatmul.mubr.f32.vlgmr.msra.gmra.mxu0 %v52_v17 }
  0xfd   :  { %v235_v19 = vpop.f32.mrf.mxu0 }
  0xfe   :  { %v161_v20 = vadd.f32 %v235_v19, %v182_v18 }
  0xff   :  { %v135_v21 = vpop.f32.mrf.mxu0 }
 0x100   :  { %163 = vst [vmem:[#allocation8 + $0x8] sm:$0xff] %v161_v20  ;;  %v160_v22 = vadd.f32 %v182_v18, %v135_v21 }
 0x102   :  { %162 = vst [vmem:[#allocation8] sm:$0xff] %v160_v22 }
 0x103   :  { %292 = shalt.err (!%p289_p0)
}
 0x104   :  { %175 = dma.vmem_to_hbm [thread:$0]  %s170_s25, 256, %s356_s3, [#allocation5], %s308_s15, %s308_s15, %s309_s16  }
 0x105   :  { %305 = dma.done.wait [#allocation5], 256  }
 0x106   :  { %306 = vsyncadd [#allocation5], 4294967040 }
 0x107   :  { %179 = vsyncpa [#allocation4], 1 }
 0x108   :  { %180 = vsyncpa [#allocation7], 1 }
 0x109   :  { %181 = vsyncpa [#allocation5], 1 }

</bundles_post_ra>
